<compile_context>
chip_gen: v5e
topology: v5e:2x2
jax: 0.10.0
libtpu: 0.0.40
codegen_flags: <defaults>
</compile_context>

<pallas_src>
import functools
import math

import jax
import jax.numpy as jnp
from jax import lax
from jax.experimental import pallas as pl
from jax.experimental.pallas import tpu as pltpu


def _round_up(x: int, m: int) -> int:
    return ((x + m - 1) // m) * m


def _cdiv(a: int, b: int) -> int:
    return (a + b - 1) // b


# ---------------------------------------------------------------------------
# Tiling helpers
# ---------------------------------------------------------------------------
_CAP_M, _CAP_N, _CAP_K = 512, 512, 1024


def _pick_tile(dim: int, cap: int, align: int):
    """Balanced tile for `dim`.

    dim <= cap -> one full-dim block (legal via the "equals the full array
                  dim" exemption), i.e. zero padding.
    dim  > cap -> ceil(dim/cap) roughly-equal tiles rounded up to `align`.
    Returns (tile, padded_dim).
    """
    if dim <= cap:
        return dim, dim
    nblk = _cdiv(dim, cap)
    tile = _round_up(_cdiv(dim, nblk), align)
    return tile, _round_up(dim, tile)


def _tiling(B: int, Out: int, In: int, x_dtype):
    align_m = 16 if x_dtype == jnp.bfloat16 else 8
    tm, B_p = _pick_tile(B, _CAP_M, align_m)
    tn, Out_p = _pick_tile(Out, _CAP_N, 128)
    tk, In_p = _pick_tile(In, _CAP_K, 128)

    # v7x has two TensorCores; "parallel" grid axes are sharded across them.
    # If the (m, n) part of the grid collapsed to one block, split a tile so
    # both cores get work.  Cheap/neutral on single-core chips.
    if (B_p // tm) * (Out_p // tn) == 1:
        if tn >= 256 and (tn // 2) % 128 == 0:
            tn //= 2
        elif tm >= 2 * align_m and (tm // 2) % align_m == 0:
            tm //= 2
    return tm, tn, tk, B_p, Out_p, In_p


def _vmem_limit_bytes() -> int:
    # v5e / v6e have 128 MiB physical VMEM -> give the pipeline headroom.
    # v7x (64 MiB physical) / unknown stays at a conservative 32 MiB.
    try:
        kind = jax.devices()[0].device_kind.lower()
    except Exception:
        return 32 * 1024 * 1024
    if ("v5 lite" in kind) or ("v5lite" in kind) or ("v5e" in kind) or ("v6" in kind):
        return 64 * 1024 * 1024
    return 32 * 1024 * 1024


def _pad2(a, rows: int, cols: int):
    R, C = a.shape
    if R == rows and C == cols:
        return a
    return jnp.pad(a, ((0, rows - R), (0, cols - C)))


def _pad1(v, n: int):
    if v.shape[0] == n:
        return v
    return jnp.pad(v, (0, n - v.shape[0]))


# ---------------------------------------------------------------------------
# Kernels
# ---------------------------------------------------------------------------
def _noisy_linear_rank1_kernel(x_ref, wmu_ref, wsig_ref, eout_ref, ein_ref,
                               b_ref, o_ref, *scratch, acc_in_out: bool):
    """Grid step (m, n, k): acc += x @ (mu + sigma * (eps_out ⊗ eps_in)).T"""
    k = pl.program_id(2)
    acc_ref = o_ref if acc_in_out else scratch[0]

    @pl.when(k == 0)
    def _():
        if acc_in_out:
            # f32 output block doubles as the accumulator; seed with the bias.
            acc_ref[...] = jnp.broadcast_to(b_ref[...], acc_ref.shape)
        else:
            acc_ref[...] = jnp.zeros_like(acc_ref)

    # Rank-1 epsilon composed on the fly from the two noise vectors (VPU
    # broadcast-mul); the full (Out, In) epsilon matrix never hits HBM/VMEM
    # as an input.
    w = wmu_ref[...] + wsig_ref[...] * (eout_ref[...] * ein_ref[...])
    x = x_ref[...]
    w = w.astype(x.dtype)  # keep both MXU operands in the same dtype

    # Contract x dim 1 with w dim 1: weights stay (Out, In), no in-kernel
    # transpose; MXU matmul with f32 accumulation.
    acc_ref[...] += lax.dot_general(
        x, w, (((1,), (1,)), ((), ())),
        preferred_element_type=jnp.float32)

    if not acc_in_out:
        @pl.when(k == pl.num_programs(2) - 1)
        def _():
            o_ref[...] = (acc_ref[...] + b_ref[...]).astype(o_ref.dtype)


def _linear_kernel(x_ref, w_ref, b_ref, o_ref, *scratch, acc_in_out: bool):
    """Plain linear step: eval mode, or a precomposed noisy weight."""
    k = pl.program_id(2)
    acc_ref = o_ref if acc_in_out else scratch[0]

    @pl.when(k == 0)
    def _():
        if acc_in_out:
            acc_ref[...] = jnp.broadcast_to(b_ref[...], acc_ref.shape)
        else:
            acc_ref[...] = jnp.zeros_like(acc_ref)

    x = x_ref[...]
    w = w_ref[...].astype(x.dtype)
    acc_ref[...] += lax.dot_general(
        x, w, (((1,), (1,)), ((), ())),
        preferred_element_type=jnp.float32)

    if not acc_in_out:
        @pl.when(k == pl.num_programs(2) - 1)
        def _():
            o_ref[...] = (acc_ref[...] + b_ref[...]).astype(o_ref.dtype)


# ---------------------------------------------------------------------------
# Wrappers
# ---------------------------------------------------------------------------
def linear_forward(x, weight, bias):
    """y = x @ weight.T + bias.

    Used for eval mode and for a weight precomposed once per reset_noise()
    via compose_noisy_params() (the big bandwidth win when epsilon is reused
    across many forwards)."""
    B, In = x.shape
    Out, In_w = weight.shape
    assert In_w == In, "weight / input feature mismatch"

    out_dtype = jnp.result_type(x.dtype, weight.dtype)
    acc_in_out = out_dtype == jnp.float32

    tm, tn, tk, B_p, Out_p, In_p = _tiling(B, Out, In, x.dtype)
    grid = (B_p // tm, Out_p // tn, In_p // tk)

    x_p = _pad2(x, B_p, In_p)
    w_p = _pad2(weight, Out_p, In_p)          # no-op for sub-cap dims
    b_p = _pad1(bias.astype(jnp.float32), Out_p).reshape(1, Out_p)

    x_spec = pl.BlockSpec((tm, tk), lambda m, n, k: (m, k))
    w_spec = pl.BlockSpec((tn, tk), lambda m, n, k: (n, k))
    b_spec = pl.BlockSpec((1, tn), lambda m, n, k: (0, n))
    o_spec = pl.BlockSpec((tm, tn), lambda m, n, k: (m, n))

    scratch = [] if acc_in_out else [pltpu.VMEM((tm, tn), jnp.float32)]

    y_p = pl.pallas_call(
        functools.partial(_linear_kernel, acc_in_out=acc_in_out),
        out_shape=jax.ShapeDtypeStruct((B_p, Out_p), out_dtype),
        grid_spec=pltpu.PrefetchScalarGridSpec(
            num_scalar_prefetch=0, grid=grid,
            in_specs=[x_spec, w_spec, b_spec],
            out_specs=o_spec,
            scratch_shapes=scratch),
        compiler_params=pltpu.CompilerParams(
            dimension_semantics=("parallel", "parallel", "arbitrary"),
            vmem_limit_bytes=_vmem_limit_bytes()),
    )(x_p, w_p, b_p)
    return y_p[:B, :Out]


def compose_noisy_params(weight_mu, weight_sigma, eps_in, eps_out,
                         bias_mu, bias_sigma, dtype=None):
    """Precompose W = mu + sigma * outer(eps_out, eps_in) and b once per
    reset_noise(); reuse with linear_forward() across forwards to cut
    per-call weight HBM traffic to a single matrix (0.5x if dtype=bf16)."""
    W = weight_mu + weight_sigma * jnp.outer(eps_out, eps_in)
    b = bias_mu + bias_sigma * eps_out
    if dtype is not None:
        W = W.astype(dtype)
    return W, b


def noisy_linear_forward(x, weight_mu, weight_sigma, eps_in, eps_out,
                         bias_mu, bias_sigma, *, training: bool = True):
    """Pallas TPU NoisyLinear.forward.

    eps_in / eps_out are the factor-noise vectors produced by reset_noise();
    the module's buffers satisfy weight_epsilon == outer(eps_out, eps_in) and
    bias_epsilon == eps_out, which this kernel exploits (rank-1 epsilon)."""
    B, In = x.shape
    Out, In_w = weight_mu.shape
    assert In_w == In, "weight / input feature mismatch"

    if not training:
        # Eval: sigma / epsilon never enter the pallas_call at all.
        return linear_forward(x, weight_mu, bias_mu)

    out_dtype = jnp.result_type(x.dtype, weight_mu.dtype)
    acc_in_out = out_dtype == jnp.float32

    tm, tn, tk, B_p, Out_p, In_p = _tiling(B, Out, In, x.dtype)
    grid = (B_p // tm, Out_p // tn, In_p // tk)

    wdt = weight_mu.dtype
    x_p = _pad2(x, B_p, In_p)
    wmu_p = _pad2(weight_mu, Out_p, In_p)       # no-op for sub-cap dims
    wsig_p = _pad2(weight_sigma, Out_p, In_p)
    eout_p = _pad1(eps_out.astype(wdt), Out_p).reshape(Out_p, 1)
    ein_p = _pad1(eps_in.astype(wdt), In_p).reshape(1, In_p)
    # Bias composition is O(Out): do it in the wrapper, stream one dense row.
    bias = bias_mu + bias_sigma * eps_out
    b_p = _pad1(bias.astype(jnp.float32), Out_p).reshape(1, Out_p)

    x_spec = pl.BlockSpec((tm, tk), lambda m, n, k: (m, k))
    w_spec = pl.BlockSpec((tn, tk), lambda m, n, k: (n, k))
    eo_spec = pl.BlockSpec((tn, 1), lambda m, n, k: (n, 0))
    ei_spec = pl.BlockSpec((1, tk), lambda m, n, k: (0, k))
    b_spec = pl.BlockSpec((1, tn), lambda m, n, k: (0, n))
    o_spec = pl.BlockSpec((tm, tn), lambda m, n, k: (m, n))

    scratch = [] if acc_in_out else [pltpu.VMEM((tm, tn), jnp.float32)]

    y_p = pl.pallas_call(
        functools.partial(_noisy_linear_rank1_kernel, acc_in_out=acc_in_out),
        out_shape=jax.ShapeDtypeStruct((B_p, Out_p), out_dtype),
        grid_spec=pltpu.PrefetchScalarGridSpec(
            num_scalar_prefetch=0, grid=grid,
            in_specs=[x_spec, w_spec, w_spec, eo_spec, ei_spec, b_spec],
            out_specs=o_spec,
            scratch_shapes=scratch),
        compiler_params=pltpu.CompilerParams(
            dimension_semantics=("parallel", "parallel", "arbitrary"),
            vmem_limit_bytes=_vmem_limit_bytes()),
    )(x_p, wmu_p, wsig_p, eout_p, ein_p, b_p)
    return y_p[:B, :Out]


# ---------------------------------------------------------------------------
# Deterministic parameter / noise construction mirroring reset_parameters()
# and reset_noise() (plain JAX, init-time only).
# ---------------------------------------------------------------------------
def _scale_noise(key, size):
    x = jax.random.normal(key, (size,), dtype=jnp.float32)
    return jnp.sign(x) * jnp.sqrt(jnp.abs(x))


def make_noisy_linear_params(key, in_features, out_features, std_init=0.5):
    k_wmu, k_bmu, k_ein, k_eout = jax.random.split(key, 4)
    mu_range = 1.0 / math.sqrt(in_features)

    weight_mu = jax.random.uniform(
        k_wmu, (out_features, in_features), jnp.float32, -mu_range, mu_range)
    weight_sigma = jnp.full((out_features, in_features),
                            std_init / math.sqrt(in_features), jnp.float32)
    bias_mu = jax.random.uniform(
        k_bmu, (out_features,), jnp.float32, -mu_range, mu_range)
    bias_sigma = jnp.full((out_features,),
                          std_init / math.sqrt(out_features), jnp.float32)

    eps_in = _scale_noise(k_ein, in_features)     # weight_epsilon = eps_out ⊗ eps_in
    eps_out = _scale_noise(k_eout, out_features)  # bias_epsilon   = eps_out
    return dict(weight_mu=weight_mu, weight_sigma=weight_sigma,
                bias_mu=bias_mu, bias_sigma=bias_sigma,
                eps_in=eps_in, eps_out=eps_out)


if __name__ == "__main__":
    def run_case(case_key, batch, in_features, out_features, tol):
        kp, kx = jax.random.split(case_key)
        p = make_noisy_linear_params(kp, in_features, out_features)
        x = jax.random.normal(kx, (batch, in_features), dtype=jnp.float32)

        w_noisy = p["weight_mu"] + p["weight_sigma"] * jnp.outer(p["eps_out"], p["eps_in"])
        b_noisy = p["bias_mu"] + p["bias_sigma"] * p["eps_out"]

        # Training mode (rank-1 noisy kernel).
        y = jax.block_until_ready(noisy_linear_forward(
            x, p["weight_mu"], p["weight_sigma"], p["eps_in"], p["eps_out"],
            p["bias_mu"], p["bias_sigma"], training=True))
        y_ref = jnp.dot(x, w_noisy.T, precision=lax.Precision.HIGHEST) + b_noisy
        assert y.shape == (batch, out_features)
        assert jnp.allclose(y, y_ref, atol=tol, rtol=tol), "train-mode mismatch"

        # Eval mode (mu weights only; sigma/eps never streamed).
        y_ev = jax.block_until_ready(noisy_linear_forward(
            x, p["weight_mu"], p["weight_sigma"], p["eps_in"], p["eps_out"],
            p["bias_mu"], p["bias_sigma"], training=False))
        y_ev_ref = jnp.dot(x, p["weight_mu"].T,
                           precision=lax.Precision.HIGHEST) + p["bias_mu"]
        assert jnp.allclose(y_ev, y_ev_ref, atol=tol, rtol=tol), "eval mismatch"

        # Precompose-once path (epsilon reused across forwards).
        W, b = compose_noisy_params(p["weight_mu"], p["weight_sigma"],
                                    p["eps_in"], p["eps_out"],
                                    p["bias_mu"], p["bias_sigma"])
        y_pc = jax.block_until_ready(linear_forward(x, W, b))
        assert jnp.allclose(y_pc, y_ref, atol=tol, rtol=tol), "precomposed mismatch"

    key = jax.random.PRNGKey(0)
    k_small, k_big = jax.random.split(key)
    # Small RL-sized layer: every block equals the full dim -> zero padding.
    run_case(k_small, batch=8, in_features=32, out_features=16, tol=1e-4)
    # Awkward tile-spanning shapes: exercises balanced tiling + minimal padding.
    run_case(k_big, batch=16, in_features=1152, out_features=640, tol=5e-3)

    print("KERNEL_OK")
</pallas_src>

<mosaic_0001>
module attributes {stable_mosaic.version = 11 : i64} {
  func.func @_noisy_linear_rank1_kernel(%arg0: i32, %arg1: i32, %arg2: i32, %arg3: memref<8x32xf32, #tpu.memory_space<vmem>>, %arg4: memref<16x32xf32, #tpu.memory_space<vmem>>, %arg5: memref<16x32xf32, #tpu.memory_space<vmem>>, %arg6: memref<16x1xf32, #tpu.memory_space<vmem>>, %arg7: memref<1x32xf32, #tpu.memory_space<vmem>>, %arg8: memref<1x16xf32, #tpu.memory_space<vmem>>, %arg9: memref<8x16xf32, #tpu.memory_space<vmem>>) attributes {dimension_semantics = [#tpu.dimension_semantics<parallel>, #tpu.dimension_semantics<parallel>, #tpu.dimension_semantics<arbitrary>], iteration_bounds = array<i64: 1, 1, 1>, scalar_prefetch = 0 : i64, scratch_operands = 0 : i64, tpu.core_type = #tpu.core_type<tc>, window_params = [{transform_indices = @transform_0, window_bounds = array<i64: 8, 32>}, {transform_indices = @transform_1, window_bounds = array<i64: 16, 32>}, {transform_indices = @transform_2, window_bounds = array<i64: 16, 32>}, {transform_indices = @transform_3, window_bounds = array<i64: 16, 1>}, {transform_indices = @transform_4, window_bounds = array<i64: 1, 32>}, {transform_indices = @transform_5, window_bounds = array<i64: 1, 16>}, {transform_indices = @transform_6, window_bounds = array<i64: 8, 16>}]} {
    %c0_i32 = arith.constant 0 : i32
    %0 = arith.cmpi eq, %arg2, %c0_i32 : i32
    %1 = arith.extui %0 : i1 to i32
    %c0_i32_0 = arith.constant 0 : i32
    %2 = arith.cmpi ne, %1, %c0_i32_0 : i32
    scf.if %2 {
      %c0_14 = arith.constant 0 : index
      %c0_15 = arith.constant 0 : index
      %17 = vector.load %arg8[%c0_14, %c0_15] : memref<1x16xf32, #tpu.memory_space<vmem>>, vector<1x16xf32>
      %18 = vector.shape_cast %17 : vector<1x16xf32> to vector<1x16xf32>
      %19 = vector.broadcast %18 : vector<1x16xf32> to vector<8x16xf32>
      %c0_16 = arith.constant 0 : index
      %c0_17 = arith.constant 0 : index
      %20 = vector.load %arg9[%c0_16, %c0_17] : memref<8x16xf32, #tpu.memory_space<vmem>>, vector<8x16xf32>
      tpu.vector_store %arg9[%c0_16, %c0_17], %19 {strides = array<i32>} : memref<8x16xf32, #tpu.memory_space<vmem>>, vector<8x16xf32>,
    } else {
    }
    %c0 = arith.constant 0 : index
    %c0_1 = arith.constant 0 : index
    %3 = vector.load %arg4[%c0, %c0_1] : memref<16x32xf32, #tpu.memory_space<vmem>>, vector<16x32xf32>
    %c0_2 = arith.constant 0 : index
    %c0_3 = arith.constant 0 : index
    %4 = vector.load %arg5[%c0_2, %c0_3] : memref<16x32xf32, #tpu.memory_space<vmem>>, vector<16x32xf32>
    %c0_4 = arith.constant 0 : index
    %c0_5 = arith.constant 0 : index
    %5 = vector.load %arg6[%c0_4, %c0_5] : memref<16x1xf32, #tpu.memory_space<vmem>>, vector<16x1xf32>
    %c0_6 = arith.constant 0 : index
    %c0_7 = arith.constant 0 : index
    %6 = vector.load %arg7[%c0_6, %c0_7] : memref<1x32xf32, #tpu.memory_space<vmem>>, vector<1x32xf32>
    %7 = vector.broadcast %5 : vector<16x1xf32> to vector<16x32xf32>
    %8 = vector.broadcast %6 : vector<1x32xf32> to vector<16x32xf32>
    %9 = arith.mulf %7, %8 : vector<16x32xf32>
    %10 = arith.mulf %4, %9 : vector<16x32xf32>
    %11 = arith.addf %3, %10 : vector<16x32xf32>
    %c0_8 = arith.constant 0 : index
    %c0_9 = arith.constant 0 : index
    %12 = vector.load %arg3[%c0_8, %c0_9] : memref<8x32xf32, #tpu.memory_space<vmem>>, vector<8x32xf32>
    %c0_10 = arith.constant 0 : index
    %c0_11 = arith.constant 0 : index
    %13 = vector.load %arg9[%c0_10, %c0_11] : memref<8x16xf32, #tpu.memory_space<vmem>>, vector<8x16xf32>
    %cst = arith.constant dense<0.000000e+00> : vector<8x16xf32>
    %14 = tpu.matmul %12, %11, %cst {dimension_numbers = #tpu.dot_dimension_numbers<[1], [1], [0], [0], [0, 0, 1, 0], [], []>} : vector<8x32xf32>, vector<16x32xf32>, vector<8x16xf32> -> vector<8x16xf32>
    %15 = arith.addf %13, %14 : vector<8x16xf32>
    %c0_12 = arith.constant 0 : index
    %c0_13 = arith.constant 0 : index
    %16 = vector.load %arg9[%c0_12, %c0_13] : memref<8x16xf32, #tpu.memory_space<vmem>>, vector<8x16xf32>
    tpu.vector_store %arg9[%c0_12, %c0_13], %15 {strides = array<i32>} : memref<8x16xf32, #tpu.memory_space<vmem>>, vector<8x16xf32>,
    return
  }
  func.func @transform_0(%arg0: i32, %arg1: i32, %arg2: i32) -> (i32, i32) {
    %c0_i32 = arith.constant 0 : i32
    return %arg0, %arg2 : i32, i32
  }
  func.func @transform_1(%arg0: i32, %arg1: i32, %arg2: i32) -> (i32, i32) {
    %c0_i32 = arith.constant 0 : i32
    return %arg1, %arg2 : i32, i32
  }
  func.func @transform_2(%arg0: i32, %arg1: i32, %arg2: i32) -> (i32, i32) {
    %c0_i32 = arith.constant 0 : i32
    return %arg1, %arg2 : i32, i32
  }
  func.func @transform_3(%arg0: i32, %arg1: i32, %arg2: i32) -> (i32, i32) {
    %c0_i32 = arith.constant 0 : i32
    %c0_i32_0 = arith.constant 0 : i32
    return %arg1, %c0_i32 : i32, i32
  }
  func.func @transform_4(%arg0: i32, %arg1: i32, %arg2: i32) -> (i32, i32) {
    %c0_i32 = arith.constant 0 : i32
    %c0_i32_0 = arith.constant 0 : i32
    return %c0_i32, %arg2 : i32, i32
  }
  func.func @transform_5(%arg0: i32, %arg1: i32, %arg2: i32) -> (i32, i32) {
    %c0_i32 = arith.constant 0 : i32
    %c0_i32_0 = arith.constant 0 : i32
    return %c0_i32, %arg1 : i32, i32
  }
  func.func @transform_6(%arg0: i32, %arg1: i32, %arg2: i32) -> (i32, i32) {
    %c0_i32 = arith.constant 0 : i32
    return %arg0, %arg1 : i32, i32
  }
}

</mosaic_0001>

<bundles_post_ra>
// kernel: tpu_custom_call.1
= control target key start
LH: loop header
LB: loop body
LE: loop exit
PB: predicated region body
PF: predicated region fallthrough
CT: control target
= control target key end

     0   :  { %11 = vsyncpa [#allocation3], 0  ;;  %s303_s0 = inlined_call_operand.hbm [shape: f32[8,32], index: 0, kind: input, shape index: {}]   ;;  %s304_s1 = inlined_call_operand.vmem [shape: f32[16,32], index: 1, kind: input, shape index: {}]   ;;  %s305_s2 = inlined_call_operand.hbm [shape: f32[16,32], index: 2, kind: input, shape index: {}]   ;;  %s306_s3 = inlined_call_operand.vmem [shape: f32[16,1], index: 3, kind: input, shape index: {}]   ;;  %s307_s4 = inlined_call_operand.vmem [shape: f32[1,32], index: 4, kind: input, shape index: {}]   ;;  %s308_s5 = inlined_call_operand.vmem [shape: f32[1,16], index: 5, kind: input, shape index: {}]   ;;  %s309_s6 = inlined_call_operand.hbm [shape: f32[8,16], index: 6, kind: output, shape index: {}]  }
   0x1   :  { %12 = vsyncpa [#allocation6], 0 }
   0x2   :  { %13 = vsyncpa [#allocation4], 0  ;;  %s19_s23 = sshll.u32 %s303_s0, 4  ;;  %s233_s24 = smov [#allocation2]   ;;  %s20_s23 = int_to_ptr.hbm [resolvable:$true] %s19_s23 }
   0x3   :  { %s21_s25 = sshll.u32 %s233_s24, 4  ;;  %s31_s28 = sshll.u32 %s305_s2, 4  ;;  %s22_s25 = int_to_ptr.vmem [resolvable:$true] %s21_s25  ;;  %s32_s28 = int_to_ptr.hbm [resolvable:$true] %s31_s28 }
   0x4   :  { %24 = dma.hbm_to_vmem [thread:$0]  %s20_s23, 128, %s22_s25, [#allocation3]  }
   0x5   :  { %s234_s29 = smov [#allocation5]   ;;  %s235_s7 = smov 128  }
   0x6   :  { %s33_s30 = sshll.u32 %s234_s29, 4  ;;  %s236_s8 = smov 8   ;;  %s34_s30 = int_to_ptr.vmem [resolvable:$true] %s33_s30 }
   0x7   :  { %39 = dma.hbm_to_vmem [thread:$0]  %s32_s28, 256, %s34_s30, [#allocation6], %s235_s7, %s235_s7, %s236_s8  }
   0x8   :  { %227 = dma.done.wait [#allocation3], 128  }
   0x9   :  { %228 = vsyncadd [#allocation3], 4294967168 }
   0xa   :  { %229 = dma.done.wait [#allocation6], 256  }
   0xb   :  { %230 = vsyncadd [#allocation6], 4294967040  ;;  %v237_v0 = vmov 0   ;;  %v69_v1 = vld [vmem:[%s306_s3 + $0x8] sm:$0xff]  ;;  %v68_v2 = vld [vmem:[%s306_s3] sm:$0xff]  ;;  %vm62_vm0 = vcmask 130048  }
   0xc   :  { %152 = vset.pattern.permute.xlu0 %v237_v0  ;;  %v154_v3 = vld [vmem:[%s308_s5] ss:$0 sm:$0xff]  ;;  %v67_v6 = vld [vmem:[#allocation5 + $0x8] sm:$0xff]  ;;  %v65_v8 = vld [vmem:[%s304_s1 + $0x8] sm:$0xff]  ;;  %vm92_vm1 = vcmask 261120   ;;  %s132_s20 = sshll.u32 %s309_s6, 4  ;;  %s133_s20 = int_to_ptr.hbm [resolvable:$true] %s132_s20 }
   0xd   :  { %78 = vperm.xlu0 %152, %v69_v1   ;;  %63 = vst.msk [vmem:[#allocation7] sm:$0xff] %vm62_vm0, %v154_v3  ;;  %v153_v4 = vld [vmem:[%s307_s4] ss:$0 sm:$0xff]  ;;  %v66_v12 = vld [vmem:[#allocation5] sm:$0xff]  ;;  %s238_s4 = smov [#allocation7]  }
   0xe   :  { %v64_v14 = vld [vmem:[%s304_s1] sm:$0xff]  ;;  %s130_s17 = sshll.u32 %s238_s4, 4  ;;  %s131_s17 = int_to_ptr.vmem [resolvable:$true] %s130_s17 }
   0xf   :  { %v90_v17 = vld [vmem:[#allocation2] sm:$0xff] }
  0x14   :  { %v91_v18 = vld [vmem:[#allocation7] sm:$0xff] }
  0x15   :  { %73 = vperm.xlu0 %152, %v68_v2  }
  0x7f   :  { %v79_v5 = vpop.permute.xlu0 %78 }
  0x80   :  { %v85_v7 = vmul.f32 %v153_v4, %v79_v5 }
  0x82   :  { %v87_v9 = vmul.f32 %v85_v7, %v67_v6 }
  0x84   :  { %v89_v10 = vadd.f32 %v87_v9, %v65_v8 }
  0x86   :  { %143 = vmatpush.xpose.msk.msra.mxu0 %vm92_vm1, %v89_v10 }
  0x87   :  { %v74_v11 = vpop.permute.xlu0 %73 }
  0x88   :  { %v84_v13 = vmul.f32 %v153_v4, %v74_v11 }
  0x8a   :  { %v86_v15 = vmul.f32 %v84_v13, %v66_v12 }
  0x8c   :  { %v88_v16 = vadd.f32 %v86_v15, %v64_v14 }
  0x8e   :  { %144 = vmatpush.xpose.msk.msra.mxu0 %vm92_vm1, %v88_v16 }
  0x91   :  { %145 = vmatmul.msk.f32.vlgmr.msra.gmra.mxu0 %vm92_vm1, %v90_v17 }
 0x10e   :  { %v119_v19 = vpop.f32.mrf.mxu0 }
 0x10f   :  { %v122_v20 = vadd.f32 %v119_v19, %v91_v18 }
 0x111   :  { %124 = vst.msk [vmem:[#allocation7] sm:$0xff] %vm62_vm0, %v122_v20 }
 0x112   :  { %135 = dma.vmem_to_hbm [thread:$0]  %s131_s17, 128, %s133_s20, [#allocation4]  }
 0x113   :  { %231 = dma.done.wait [#allocation4], 128  }
 0x114   :  { %232 = vsyncadd [#allocation4], 4294967168 }
 0x115   :  { %140 = vsyncpa [#allocation3], 1 }
 0x116   :  { %141 = vsyncpa [#allocation6], 1 }
 0x117   :  { %142 = vsyncpa [#allocation4], 1 }

</bundles_post_ra>
